<compile_context>
chip_gen: v7x
topology: tpu7x:2x2x1
jax: 0.10.0
libtpu: 0.0.40
codegen_flags: <defaults>
</compile_context>

<pallas_src>
import functools
import math

import jax
import jax.numpy as jnp
import numpy as np
from jax import lax
from jax.experimental import pallas as pl
from jax.experimental.pallas import tpu as pltpu


# ---------------------------------------------------------------------------
# VMEM budget: generation-aware (v5e/v6e: 128 MiB, v7x: 64 MiB) with a safe
# fallback if the hardware query is unavailable.
# ---------------------------------------------------------------------------
def _vmem_budget_bytes():
    cap = None
    try:
        info = pltpu.get_tpu_info()
        cap = getattr(info, "vmem_capacity_bytes", None)
    except Exception:
        cap = None
    if not cap or cap <= 0:
        cap = 64 * 1024 * 1024            # conservative: v7x has 64 MiB / TC
    # leave pipelining/compiler headroom; ~96-100 MiB sweet spot on 128 MiB chips
    return int(min(cap * 3 // 4, 100 * 1024 * 1024))


# ---------------------------------------------------------------------------
# Kernel 1: Conv1D (linear)  out = x @ W + b, tiled with f32 accumulation.
# ---------------------------------------------------------------------------
def _pick_tile(dim, preferred):
    """Largest preferred tile that evenly divides `dim`, else the full dim."""
    for t in preferred:
        if t <= dim and dim % t == 0:
            return t
    return dim  # full-dim fallback (small / ragged dims)


def _shrink_to_fit(tm, tn, tk, in_bytes, out_bytes, budget):
    """Halve tiles (divisibility is preserved by halving) until they fit VMEM."""
    def usage(tm_, tn_, tk_):
        return (2 * (tm_ * tk_ + tk_ * tn_) * in_bytes   # double-buffered x, w
                + 2 * tn_ * 4                            # bias tile (f32)
                + 2 * tm_ * tn_ * out_bytes              # double-buffered out
                + tm_ * tn_ * 4)                         # f32 accumulator
    while usage(tm, tn, tk) > budget and tk > 128 and tk % 2 == 0:
        tk //= 2
    while usage(tm, tn, tk) > budget and tn > 128 and tn % 2 == 0:
        tn //= 2
    while usage(tm, tn, tk) > budget and tm > 128 and tm % 2 == 0:
        tm //= 2
    return tm, tn, tk


def _linear_kernel(x_ref, w_ref, b_ref, o_ref, acc_ref):
    @pl.when(pl.program_id(2) == 0)
    def _():
        acc_ref[...] = jnp.zeros_like(acc_ref)

    acc_ref[...] += jnp.dot(x_ref[...], w_ref[...],
                            preferred_element_type=jnp.float32)

    @pl.when(pl.program_id(2) == pl.num_programs(2) - 1)
    def _():
        o_ref[...] = (acc_ref[...] + b_ref[...]).astype(o_ref.dtype)


def linear_pallas(x2d, w, b, *, out_dtype=None):
    """x2d: (M, K), w: (K, N), b: (N,) -> (M, N).  Inputs are used as-is
    (pre-cast to bf16 in HBM by the caller on the fast path)."""
    M, K = x2d.shape
    N = w.shape[1]
    out_dtype = out_dtype if out_dtype is not None else x2d.dtype
    budget = _vmem_budget_bytes()

    # MXU-friendly tiles (v6e/v7x MXU is 2x256x256; v5e native 128); big tiles
    # amortize the ~0.35us/grid-step overhead and stay near the HBM roofline.
    tm = _pick_tile(M, (512, 256, 128, 64, 32, 16, 8))
    tn = _pick_tile(N, (512, 256, 128))
    tk = _pick_tile(K, (512, 256, 128))
    tm, tn, tk = _shrink_to_fit(tm, tn, tk,
                                jnp.dtype(x2d.dtype).itemsize,
                                jnp.dtype(out_dtype).itemsize, budget)
    grid = (M // tm, N // tn, K // tk)

    return pl.pallas_call(
        _linear_kernel,
        out_shape=jax.ShapeDtypeStruct((M, N), out_dtype),
        grid_spec=pltpu.PrefetchScalarGridSpec(
            num_scalar_prefetch=0,
            grid=grid,
            in_specs=[
                pl.BlockSpec((tm, tk), lambda i, j, k: (i, k)),
                pl.BlockSpec((tk, tn), lambda i, j, k: (k, j)),
                pl.BlockSpec((1, tn), lambda i, j, k: (0, j)),   # bias per j
            ],
            out_specs=pl.BlockSpec((tm, tn), lambda i, j, k: (i, j)),
            scratch_shapes=[pltpu.VMEM((tm, tn), jnp.float32)],
        ),
        compiler_params=pltpu.CompilerParams(
            dimension_semantics=("parallel", "parallel", "arbitrary"),
            vmem_limit_bytes=budget,
        ),
    )(x2d, w, b.reshape(1, N).astype(jnp.float32))


# ---------------------------------------------------------------------------
# Kernel 2: flash-style causal attention.
#   grid = (B, T/tq, T/tk); all heads of one (batch, q-tile) per grid step.
#   Output is written directly in merged-head (B, T, nx) layout.
# ---------------------------------------------------------------------------
def _flash_attn_kernel(q_ref, k_ref, v_ref, o_ref, m_sc, l_sc, acc_sc, *,
                       n_head, hd, tq, tk, scale, use_bf16):
    qi = pl.program_id(1)
    ki = pl.program_id(2)
    nk = pl.num_programs(2)

    @pl.when(ki == 0)
    def _():
        m_sc[...] = jnp.full(m_sc.shape, -jnp.inf, m_sc.dtype)
        l_sc[...] = jnp.zeros(l_sc.shape, l_sc.dtype)
        acc_sc[...] = jnp.zeros(acc_sc.shape, acc_sc.dtype)

    q_start = qi * tq
    k_start = ki * tk

    # Causal block skip: KV blocks strictly above the diagonal contribute
    # nothing -> skip compute entirely (~2x fewer score FLOPs at large T).
    @pl.when(k_start <= q_start + (tq - 1))
    def _():
        rows = q_start + lax.broadcasted_iota(jnp.int32, (tq, tk), 0)
        cols = k_start + lax.broadcasted_iota(jnp.int32, (tq, tk), 1)
        causal = cols <= rows
        neg_big = jnp.float32(-1e18)      # matches torch: w*b - 1e18*(1-b)
        inv_sqrt_hd = 1.0 / math.sqrt(hd)

        for h in range(n_head):
            # TODO(synk): hd < 128 slices cross (8,128) vreg tiles; a
            # head-major qkv layout from c_attn's out_spec would make these
            # loads free rectangular DMAs -- measure the trade-off.
            q = q_ref[0, :, h * hd:(h + 1) * hd]          # (tq, hd)
            k = k_ref[0, :, h * hd:(h + 1) * hd]          # (tk, hd)
            v = v_ref[0, :, h * hd:(h + 1) * hd]          # (tk, hd)
            if scale:
                # Fold 1/sqrt(hd) into the (tq,hd) Q tile instead of the
                # (tq,tk) score tile: ~T/hd fewer VPU multiplies.
                q = q * jnp.asarray(inv_sqrt_hd, q.dtype)

            # q @ k^T without materializing a transposed k.
            s = lax.dot_general(q, k, (((1,), (1,)), ((), ())),
                                preferred_element_type=jnp.float32)
            s = jnp.where(causal, s, neg_big)

            m_prev = m_sc[h]                               # (tq, 1)
            m_new = jnp.maximum(m_prev, jnp.max(s, axis=-1, keepdims=True))
            alpha = jnp.exp(m_prev - m_new)
            p = jnp.exp(s - m_new)
            l_sc[h] = alpha * l_sc[h] + jnp.sum(p, axis=-1, keepdims=True)
            pv = jnp.dot(p.astype(v.dtype), v,
                         preferred_element_type=jnp.float32)
            # Per-head slice store into the merged-head accumulator frees the
            # partial result immediately (no trailing concatenate).
            acc_sc[:, h * hd:(h + 1) * hd] = (
                alpha * acc_sc[:, h * hd:(h + 1) * hd] + pv)
            m_sc[h] = m_new

    @pl.when(ki == nk - 1)
    def _():
        for h in range(n_head):
            if use_bf16:
                inv = pl.reciprocal(l_sc[h], approx=True)   # EUP vrcp
            else:
                inv = 1.0 / l_sc[h]                          # exact (torch)
            acc_sc[:, h * hd:(h + 1) * hd] = (
                acc_sc[:, h * hd:(h + 1) * hd] * inv)
        # Single lane-dense store in merged-head (tq, nx) layout.
        o_ref[0] = acc_sc[...].astype(o_ref.dtype)


def _attn_seq_tile(T):
    for t in (256, 128):
        if T % t == 0:
            return t
    return T


def attention_forward(x, w_attn, b_attn, w_proj, b_proj, n_head, scale=True,
                      use_bf16=False):
    """Equivalent of Attention.forward(x) with layer_past=None, masks=None."""
    B, T, nx = x.shape
    hd = nx // n_head
    budget = _vmem_budget_bytes()

    if use_bf16:
        # Pre-cast weights/activations to bf16 in HBM: halves matmul DMA bytes
        # and removes per-element VPU casts inside the kernels; intermediates
        # (qkv, attn_out) round-trip HBM at half width too.
        x_in = x.astype(jnp.bfloat16)
        w_attn_k = w_attn.astype(jnp.bfloat16)
        w_proj_k = w_proj.astype(jnp.bfloat16)
        inter_dtype = jnp.bfloat16
    else:
        x_in, w_attn_k, w_proj_k = x, w_attn, w_proj
        inter_dtype = x.dtype

    # c_attn
    qkv = linear_pallas(x_in.reshape(B * T, nx), w_attn_k, b_attn,
                        out_dtype=inter_dtype).reshape(B, T, 3 * nx)

    # Flash attention: grid over (batch, q tiles, kv tiles).
    tq = _attn_seq_tile(T)
    tk = _attn_seq_tile(T)
    nq, nkv = T // tq, T // tk

    if nx % 128 == 0:
        # Lane-aligned nx: keep qkv packed and select the q/k/v chunk via the
        # last-dim block index (no extra HBM split traffic).
        attn_inputs = (qkv, qkv, qkv)
        q_spec = pl.BlockSpec((1, tq, nx), lambda b, qi, ki: (b, qi, 0))
        k_spec = pl.BlockSpec((1, tk, nx), lambda b, qi, ki: (b, ki, 1))
        v_spec = pl.BlockSpec((1, tk, nx), lambda b, qi, ki: (b, ki, 2))
    else:
        # Unaligned nx (e.g. tiny demo shapes): split in the wrapper so the
        # block's last dim equals the array's last dim (satisfies (8,128)).
        attn_inputs = (qkv[:, :, :nx], qkv[:, :, nx:2 * nx], qkv[:, :, 2 * nx:])
        q_spec = pl.BlockSpec((1, tq, nx), lambda b, qi, ki: (b, qi, 0))
        k_spec = pl.BlockSpec((1, tk, nx), lambda b, qi, ki: (b, ki, 0))
        v_spec = pl.BlockSpec((1, tk, nx), lambda b, qi, ki: (b, ki, 0))

    attn_out = pl.pallas_call(
        functools.partial(_flash_attn_kernel, n_head=n_head, hd=hd, tq=tq,
                          tk=tk, scale=scale, use_bf16=use_bf16),
        out_shape=jax.ShapeDtypeStruct((B, T, nx), inter_dtype),
        grid_spec=pltpu.PrefetchScalarGridSpec(
            num_scalar_prefetch=0,
            grid=(B, nq, nkv),
            in_specs=[q_spec, k_spec, v_spec],
            out_specs=pl.BlockSpec((1, tq, nx), lambda b, qi, ki: (b, qi, 0)),
            scratch_shapes=[
                pltpu.VMEM((n_head, tq, 1), jnp.float32),   # running max
                pltpu.VMEM((n_head, tq, 1), jnp.float32),   # running sum
                pltpu.VMEM((tq, nx), jnp.float32),          # merged-head acc
            ],
        ),
        compiler_params=pltpu.CompilerParams(
            dimension_semantics=("parallel", "parallel", "arbitrary"),
            vmem_limit_bytes=budget,
        ),
    )(*attn_inputs)

    # present = stack((key.transpose(-2,-1), value)) -> (2, B, H, T, hd)
    # TODO(synk): could be emitted from VMEM-resident K/V blocks inside the
    # attention kernel to save this HBM round trip (minor; kept in XLA).
    kh = qkv[:, :, nx:2 * nx].reshape(B, T, n_head, hd).transpose(0, 2, 1, 3)
    vh = qkv[:, :, 2 * nx:].reshape(B, T, n_head, hd).transpose(0, 2, 1, 3)
    present = jnp.stack((kh, vh)).astype(x.dtype)

    # c_proj + resid_dropout (identity in eval / p=0)
    a = linear_pallas(attn_out.reshape(B * T, nx), w_proj_k, b_proj,
                      out_dtype=x.dtype).reshape(B, T, nx)
    return a, present


# ---------------------------------------------------------------------------
# Pure-JAX reference (mirrors the PyTorch math) for verification.
# ---------------------------------------------------------------------------
def attention_ref(x, w_attn, b_attn, w_proj, b_proj, n_head, scale=True):
    B, T, nx = x.shape
    hd = nx // n_head
    qkv = x @ w_attn + b_attn
    q, k, v = jnp.split(qkv, 3, axis=2)
    sh = lambda t: t.reshape(B, T, n_head, hd).transpose(0, 2, 1, 3)
    qh, kh, vh = sh(q), sh(k), sh(v)
    w = jnp.einsum("bhqd,bhkd->bhqk", qh, kh)
    if scale:
        w = w / jnp.sqrt(jnp.float32(hd))
    mask = jnp.tril(jnp.ones((T, T), jnp.float32))
    w = w * mask - 1e18 * (1.0 - mask)
    w = jax.nn.softmax(w, axis=-1)
    a = jnp.einsum("bhqk,bhkd->bhqd", w, vh)
    a = a.transpose(0, 2, 1, 3).reshape(B, T, nx)
    a = a @ w_proj + b_proj
    present = jnp.stack((kh, vh))
    return a, present


def _make_params(key, nx):
    k1, k2, k3, k4, k5 = jax.random.split(key, 5)
    return (0.02 * jax.random.normal(k2, (nx, 3 * nx), jnp.float32),
            0.02 * jax.random.normal(k3, (3 * nx,), jnp.float32),
            0.02 * jax.random.normal(k4, (nx, nx), jnp.float32),
            0.02 * jax.random.normal(k5, (nx,), jnp.float32),
            k1)


if __name__ == "__main__":
    key = jax.random.PRNGKey(0)

    # --- Config 1: small shapes consistent with the module ------------------
    B, T, nx, n_head = 2, 8, 32, 4
    w_attn, b_attn, w_proj, b_proj, kx = _make_params(key, nx)
    x = jax.random.normal(kx, (B, T, nx), jnp.float32)

    a_ref, present_ref = attention_ref(x, w_attn, b_attn, w_proj, b_proj,
                                       n_head, scale=True)

    # Precise path: f32 MXU inputs, exact softmax normalization.
    a, present = attention_forward(x, w_attn, b_attn, w_proj, b_proj, n_head,
                                   scale=True, use_bf16=False)
    jax.block_until_ready(a)
    jax.block_until_ready(present)
    np.testing.assert_allclose(np.asarray(a), np.asarray(a_ref),
                               rtol=1e-4, atol=1e-5)
    np.testing.assert_allclose(np.asarray(present), np.asarray(present_ref),
                               rtol=1e-4, atol=1e-5)

    # Fast path: bf16 weights/activations/intermediates + approx reciprocal.
    a16, present16 = attention_forward(x, w_attn, b_attn, w_proj, b_proj,
                                       n_head, scale=True, use_bf16=True)
    jax.block_until_ready(a16)
    jax.block_until_ready(present16)
    np.testing.assert_allclose(np.asarray(a16), np.asarray(a_ref),
                               rtol=5e-2, atol=5e-3)
    np.testing.assert_allclose(np.asarray(present16), np.asarray(present_ref),
                               rtol=5e-2, atol=5e-3)

    # --- Config 2: lane-aligned nx + multi-tile flash (causal block skip) ---
    B2, T2, nx2, n_head2 = 1, 384, 128, 4
    w_attn2, b_attn2, w_proj2, b_proj2, kx2 = _make_params(
        jax.random.PRNGKey(1), nx2)
    x2 = jax.random.normal(kx2, (B2, T2, nx2), jnp.float32)
    a2_ref, p2_ref = attention_ref(x2, w_attn2, b_attn2, w_proj2, b_proj2,
                                   n_head2, scale=True)
    a2, p2 = attention_forward(x2, w_attn2, b_attn2, w_proj2, b_proj2,
                               n_head2, scale=True, use_bf16=False)
    jax.block_until_ready(a2)
    jax.block_until_ready(p2)
    np.testing.assert_allclose(np.asarray(a2), np.asarray(a2_ref),
                               rtol=1e-4, atol=1e-5)
    np.testing.assert_allclose(np.asarray(p2), np.asarray(p2_ref),
                               rtol=1e-4, atol=1e-5)

    # TODO(synk): attn/resid dropout are identity here (eval mode); stateful
    # PRNG dropout could be added with pltpu.prng_seed / stateful_bernoulli.
    print("KERNEL_OK")
</pallas_src>

<mosaic_0001>
module attributes {stable_mosaic.version = 11 : i64} {
  func.func @_linear_kernel(%arg0: i32, %arg1: i32, %arg2: i32, %arg3: memref<16x32xf32, #tpu.memory_space<vmem>>, %arg4: memref<32x96xf32, #tpu.memory_space<vmem>>, %arg5: memref<1x96xf32, #tpu.memory_space<vmem>>, %arg6: memref<16x96xf32, #tpu.memory_space<vmem>>, %arg7: memref<16x96xf32, #tpu.memory_space<vmem>>) attributes {dimension_semantics = [#tpu.dimension_semantics<parallel>, #tpu.dimension_semantics<parallel>, #tpu.dimension_semantics<arbitrary>], iteration_bounds = array<i64: 1, 1, 1>, scalar_prefetch = 0 : i64, scratch_operands = 1 : i64, tpu.core_type = #tpu.core_type<tc>, window_params = [{transform_indices = @transform_0, window_bounds = array<i64: 16, 32>}, {transform_indices = @transform_1, window_bounds = array<i64: 32, 96>}, {transform_indices = @transform_2, window_bounds = array<i64: 1, 96>}, {transform_indices = @transform_3, window_bounds = array<i64: 16, 96>}]} {
    %c0_i32 = arith.constant 0 : i32
    %0 = arith.cmpi eq, %arg2, %c0_i32 : i32
    %1 = arith.extui %0 : i1 to i32
    %c0_i32_0 = arith.constant 0 : i32
    %2 = arith.cmpi ne, %1, %c0_i32_0 : i32
    scf.if %2 {
      %cst_10 = arith.constant 0.000000e+00 : f32
      %12 = vector.broadcast %cst_10 : f32 to vector<16x96xf32>
      %c0_11 = arith.constant 0 : index
      %c0_12 = arith.constant 0 : index
      %13 = vector.load %arg7[%c0_11, %c0_12] : memref<16x96xf32, #tpu.memory_space<vmem>>, vector<16x96xf32>
      tpu.vector_store %arg7[%c0_11, %c0_12], %12 {strides = array<i32>} : memref<16x96xf32, #tpu.memory_space<vmem>>, vector<16x96xf32>,
    } else {
    }
    %c0 = arith.constant 0 : index
    %c0_1 = arith.constant 0 : index
    %3 = vector.load %arg7[%c0, %c0_1] : memref<16x96xf32, #tpu.memory_space<vmem>>, vector<16x96xf32>
    %c0_2 = arith.constant 0 : index
    %c0_3 = arith.constant 0 : index
    %4 = vector.load %arg3[%c0_2, %c0_3] : memref<16x32xf32, #tpu.memory_space<vmem>>, vector<16x32xf32>
    %c0_4 = arith.constant 0 : index
    %c0_5 = arith.constant 0 : index
    %5 = vector.load %arg4[%c0_4, %c0_5] : memref<32x96xf32, #tpu.memory_space<vmem>>, vector<32x96xf32>
    %cst = arith.constant dense<0.000000e+00> : vector<16x96xf32>
    %6 = tpu.matmul %4, %5, %cst {dimension_numbers = #tpu.dot_dimension_numbers<[1], [0], [0], [1], [0, 0, 1, 1], [], []>} : vector<16x32xf32>, vector<32x96xf32>, vector<16x96xf32> -> vector<16x96xf32>
    %7 = arith.addf %3, %6 : vector<16x96xf32>
    %c0_6 = arith.constant 0 : index
    %c0_7 = arith.constant 0 : index
    %8 = vector.load %arg7[%c0_6, %c0_7] : memref<16x96xf32, #tpu.memory_space<vmem>>, vector<16x96xf32>
    tpu.vector_store %arg7[%c0_6, %c0_7], %7 {strides = array<i32>} : memref<16x96xf32, #tpu.memory_space<vmem>>, vector<16x96xf32>,
    %c0_i32_8 = arith.constant 0 : i32
    %9 = arith.cmpi eq, %arg2, %c0_i32_8 : i32
    %10 = arith.extui %9 : i1 to i32
    %c0_i32_9 = arith.constant 0 : i32
    %11 = arith.cmpi ne, %10, %c0_i32_9 : i32
    scf.if %11 {
      %c0_10 = arith.constant 0 : index
      %c0_11 = arith.constant 0 : index
      %12 = vector.load %arg7[%c0_10, %c0_11] : memref<16x96xf32, #tpu.memory_space<vmem>>, vector<16x96xf32>
      %c0_12 = arith.constant 0 : index
      %c0_13 = arith.constant 0 : index
      %13 = vector.load %arg5[%c0_12, %c0_13] : memref<1x96xf32, #tpu.memory_space<vmem>>, vector<1x96xf32>
      %14 = vector.broadcast %13 : vector<1x96xf32> to vector<16x96xf32>
      %15 = arith.addf %12, %14 : vector<16x96xf32>
      %c0_14 = arith.constant 0 : index
      %c0_15 = arith.constant 0 : index
      %16 = vector.load %arg6[%c0_14, %c0_15] : memref<16x96xf32, #tpu.memory_space<vmem>>, vector<16x96xf32>
      tpu.vector_store %arg6[%c0_14, %c0_15], %15 {strides = array<i32>} : memref<16x96xf32, #tpu.memory_space<vmem>>, vector<16x96xf32>,
    } else {
    }
    return
  }
  func.func @transform_0(%arg0: i32, %arg1: i32, %arg2: i32) -> (i32, i32) {
    %c0_i32 = arith.constant 0 : i32
    return %arg0, %arg2 : i32, i32
  }
  func.func @transform_1(%arg0: i32, %arg1: i32, %arg2: i32) -> (i32, i32) {
    %c0_i32 = arith.constant 0 : i32
    return %arg2, %arg1 : i32, i32
  }
  func.func @transform_2(%arg0: i32, %arg1: i32, %arg2: i32) -> (i32, i32) {
    %c0_i32 = arith.constant 0 : i32
    %c0_i32_0 = arith.constant 0 : i32
    return %c0_i32, %arg1 : i32, i32
  }
  func.func @transform_3(%arg0: i32, %arg1: i32, %arg2: i32) -> (i32, i32) {
    %c0_i32 = arith.constant 0 : i32
    return %arg0, %arg1 : i32, i32
  }
}

</mosaic_0001>

<bundles_post_ra>
// kernel: tpu_custom_call.1
= control target key start
LH: loop header
LB: loop body
LE: loop exit
PB: predicated region body
PF: predicated region fallthrough
CT: control target
= control target key end

     0   :  { %8 = vsyncpa [#allocation4], 0  ;;  %s365_s0 = inlined_call_operand.hbm [shape: f32[16,32], index: 0, kind: input, shape index: {}]   ;;  %s366_s1 = inlined_call_operand.hbm [shape: f32[32,96], index: 1, kind: input, shape index: {}]   ;;  %s367_s2 = inlined_call_operand.vmem [shape: f32[1,96], index: 2, kind: input, shape index: {}]   ;;  %s368_s3 = inlined_call_operand.hbm [shape: f32[16,96], index: 3, kind: output, shape index: {}]  }
   0x1   :  { %9 = vsyncpa [#allocation7], 0 }
   0x2   :  { %10 = vsyncpa [#allocation5], 0  ;;  %s285_s12 = smov [#allocation3]   ;;  %s213_s16 = scalar_lea.hbm %s365_s0, 256 }
   0x3   :  { %s16_s13 = sshll.u32 %s285_s12, 4  ;;  %p214_p0 = scmp.ne.s32.totalorder %s365_s0, %s213_s16  ;;  %s17_s13 = int_to_ptr.vmem [resolvable:$true] %s16_s13 }
   0x4   :  { %p217_p1 = scmp.lt.u32.totalorder %s213_s16, %s365_s0 }
   0x6   :  { %p219_p2 = pnand %p217_p1, %p214_p0 }
   0x8   :  { %222 = shalt.err (!%p219_p2)
}
   0x9   :  { %s223_s21 = scalar_lea.vmem %s17_s13, 256  ;;  %p228_p4 = scmp.lt.s32.totalorder %s17_s13, %s17_s13 }
   0xa   :  { %p224_p3 = scmp.ne.s32.totalorder %s17_s13, %s223_s21  ;;  %p229_p5 = scmp.lt.s32.totalorder %s223_s21, %s223_s21 }
   0xc   :  { %p230_p6 = por %p229_p5, %p228_p4 }
   0xe   :  { %p231_p7 = pnand %p230_p6, %p224_p3 }
  0x10   :  { %234 = shalt.err (!%p231_p7)
}
  0x11   :  { %s286_s22 = smov 128   ;;  %s287_s23 = smov 8  }
  0x12   :  { %22 = dma.hbm_to_vmem [thread:$0]  %s365_s0, 256, %s17_s13, [#allocation4], %s286_s22, %s286_s22, %s287_s23  }
  0x13   :  { %s288_s26 = smov [#allocation6]   ;;  %s235_s30 = scalar_lea.hbm %s366_s1, 512 }
  0x14   :  { %s28_s27 = sshll.u32 %s288_s26, 4  ;;  %p236_p8 = scmp.ne.s32.totalorder %s366_s1, %s235_s30  ;;  %s29_s27 = int_to_ptr.vmem [resolvable:$true] %s28_s27 }
  0x15   :  { %p239_p9 = scmp.lt.u32.totalorder %s235_s30, %s366_s1 }
  0x17   :  { %p241_p10 = pnand %p239_p9, %p236_p8 }
  0x19   :  { %244 = shalt.err (!%p241_p10)
}
  0x1a   :  { %s245_s8 = scalar_lea.vmem %s29_s27, 512  ;;  %p250_p12 = scmp.lt.s32.totalorder %s29_s27, %s29_s27 }
  0x1b   :  { %p246_p11 = scmp.ne.s32.totalorder %s29_s27, %s245_s8  ;;  %p251_p13 = scmp.lt.s32.totalorder %s245_s8, %s245_s8 }
  0x1d   :  { %p252_p0 = por %p251_p13, %p250_p12 }
  0x1f   :  { %p253_p1 = pnand %p252_p0, %p246_p11 }
  0x21   :  { %256 = shalt.err (!%p253_p1)
}
  0x22   :  { %34 = dma.hbm_to_vmem [thread:$0]  %s366_s1, 512, %s29_s27, [#allocation7], %s286_s22, %s286_s22, %s287_s23  }
  0x23   :  { %279 = dma.done.wait [#allocation4], 256  }
  0x24   :  { %280 = vsyncadd [#allocation4], 4294967040 }
  0x25   :  { %281 = dma.done.wait [#allocation7], 512  }
  0x26   :  { %282 = vsyncadd [#allocation7], 4294966784  ;;  %vm47_vm0 = vcmask 785408   ;;  %v289_v0 = vmov 0.0   ;;  %vm58_vm1 = vcmask 261120   ;;  %v54_v1 = vld [vmem:[#allocation6] sm:$0xff] }
  0x27   :  { %49 = vst.msk [vmem:[#allocation2 + $0x8] sm:$0xff] %vm47_vm0, %v289_v0  ;;  %48 = vst.msk [vmem:[#allocation2] sm:$0xff] %vm47_vm0, %v289_v0  ;;  %v55_v2 = vld [vmem:[#allocation6 + $0x8] sm:$0xff]  ;;  %v56_v3 = vld [vmem:[#allocation6 + $0x10] sm:$0xff]  ;;  %s290_s11 = smov [#allocation8]  }
  0x28   :  { %v199_v4 = vpack.c.bf16 %v55_v2, %v54_v1  ;;  %v57_v5 = vld [vmem:[#allocation6 + $0x18] sm:$0xff]  ;;  %v52_v6 = vld [vmem:[#allocation3] sm:$0xff]  ;;  %v181_v15 = vld [vmem:[%s367_s2] ss:$0 sm:$0xff]  ;;  %s166_s12 = sshll.u32 %s290_s11, 4  ;;  %s167_s12 = int_to_ptr.vmem [resolvable:$true] %s166_s12 }
  0x29   :  { %v203_v7 = vpack.c.bf16 %v57_v5, %v56_v3  ;;  %196 = vmatprep.mubr.msk.f32.mxu0 %vm58_vm1, %v52_v6  ;;  %v53_v8 = vld [vmem:[#allocation3 + $0x8] sm:$0xff]  ;;  %s257_s13 = scalar_lea.vmem %s167_s12, 256  ;;  %p262_p3 = scmp.lt.s32.totalorder %s167_s12, %s167_s12 }
  0x2a   :  { %200 = vmatprep.subr.bf16.mxu0 %v199_v4  ;;  %p258_p2 = scmp.ne.s32.totalorder %s167_s12, %s257_s13  ;;  %p263_p4 = scmp.lt.s32.totalorder %s257_s13, %s257_s13 }
  0x2b   :  { %202 = vmatpush3.bf16.msra.mxu0 %v199_v4 }
  0x2c   :  { %204 = vmatprep.subr.bf16.mxu0 %v203_v7  ;;  %p264_p5 = por %p263_p4, %p262_p3 }
  0x2e   :  { %v51_v9 = vld [vmem:[#allocation2 + $0x8] sm:$0xff]  ;;  %v50_v10 = vld [vmem:[#allocation2] sm:$0xff]  ;;  %p265_p6 = pnand %p264_p5, %p258_p2 }
  0x2f   :  { %206 = vmatpush3.bf16.msra.mxu0 %v203_v7 }
  0x32   :  { %197 = vmatmul.mubr.msk.f32.vlgmr.msra.gmra.mrb[0].mxu0 %vm58_vm1, %v53_v8 }
 0x105   :  { %v198_v11 = vpop.f32.mrb[0].mxu0 }
 0x106   :  { %v141_v12 = vadd.f32 %v198_v11, %v51_v9  ;;  %v131_v13 = vpop.f32.mrb[1].mxu0 }
 0x107   :  { %v140_v14 = vadd.f32 %v131_v13, %v50_v10 }
 0x108   :  { %144 = vst.msk [vmem:[#allocation2 + $0x8] sm:$0xff] %vm47_vm0, %v141_v12 }
 0x109   :  { %143 = vst.msk [vmem:[#allocation2] sm:$0xff] %vm47_vm0, %v140_v14 }
 0x10f   :  { %v149_v16 = vld [vmem:[#allocation2 + $0x8] sm:$0xff] }
 0x110   :  { %v148_v17 = vld [vmem:[#allocation2] sm:$0xff]  ;;  %v158_v18 = vadd.f32 %v181_v15, %v149_v16 }
 0x111   :  { %v157_v19 = vadd.f32 %v181_v15, %v148_v17 }
 0x112   :  { %160 = vst.msk [vmem:[#allocation8 + $0x8] sm:$0xff] %vm47_vm0, %v158_v18 }
 0x113   :  { %159 = vst.msk [vmem:[#allocation8] sm:$0xff] %vm47_vm0, %v157_v19 }
 0x114   :  { %268 = shalt.err (!%p265_p6)
}
 0x115   :  { %s269_s15 = scalar_lea.hbm %s368_s3, 256 }
 0x116   :  { %p270_p7 = scmp.ne.s32.totalorder %s368_s3, %s269_s15  ;;  %p273_p8 = scmp.lt.u32.totalorder %s269_s15, %s368_s3 }
 0x118   :  { %p275_p9 = pnand %p273_p8, %p270_p7 }
 0x11a   :  { %278 = shalt.err (!%p275_p9)
}
 0x11b   :  { %172 = dma.vmem_to_hbm [thread:$0]  %s167_s12, 256, %s368_s3, [#allocation5], %s286_s22, %s286_s22, %s287_s23  }
 0x11c   :  { %283 = dma.done.wait [#allocation5], 256  }
 0x11d   :  { %284 = vsyncadd [#allocation5], 4294967040 }
 0x11e   :  { %176 = vsyncpa [#allocation4], 1 }
 0x11f   :  { %177 = vsyncpa [#allocation7], 1 }
 0x120   :  { %178 = vsyncpa [#allocation5], 1 }

</bundles_post_ra>
